<compile_context>
chip_gen: v6e
topology: v6e:2x2x1
jax: 0.10.0
libtpu: 0.0.40
codegen_flags: <defaults>
</compile_context>

<pallas_src>
import functools
import math

import jax
import jax.numpy as jnp
from jax.experimental import pallas as pl
from jax.experimental.pallas import tpu as pltpu


def _round_up(n, m):
    return ((n + m - 1) // m) * m


def _cdiv(a, b):
    return -(-a // b)


def _vmem_cap_bytes():
    """Generation-aware VMEM cap (~80% of physical per-core VMEM)."""
    try:
        phys = int(pltpu.get_tpu_info().vmem_capacity_bytes)
    except Exception:
        phys = 64 << 20  # conservative (v7x per-TC size)
    return int(phys * 0.8)


def _maybe_single_buffer_spec(shape, index_map, single_buffer):
    """BlockSpec, single-buffered when its block index is grid-constant."""
    if single_buffer and hasattr(pl, "Buffered"):
        try:
            return pl.BlockSpec(shape, index_map, pipeline_mode=pl.Buffered(1))
        except TypeError:
            pass
    return pl.BlockSpec(shape, index_map)


def _sae_kernel(x_ref, enc_w_ref, enc_b_ref, dec_w_ref, dec_b_ref,
                enc_out_ref, dec_out_ref, acc_ref, *, compute_dtype):
    k = pl.program_id(1)

    @pl.when(k == 0)
    def _():
        acc_ref[...] = jnp.zeros_like(acc_ref)

    dec_b = dec_b_ref[...]                                   # (1, d_in_p), f32

    # x_centered = x - decoder.bias  (f32 elementwise; cast only at MXU input)
    x_centered = (x_ref[...].astype(jnp.float32) - dec_b).astype(compute_dtype)

    # encoded = relu(x_centered @ enc_W.T + enc_b)   [enc_w pre-transposed]
    pre = jnp.dot(x_centered, enc_w_ref[...],
                  preferred_element_type=jnp.float32)        # (tm, tk), f32 acc
    encoded = jnp.maximum(pre + enc_b_ref[...], 0.0).astype(compute_dtype)
    enc_out_ref[...] = encoded.astype(enc_out_ref.dtype)

    # decoded partial: encoded_k @ dec_W.T_k  accumulated over hid blocks
    acc_ref[...] += jnp.dot(encoded, dec_w_ref[...],
                            preferred_element_type=jnp.float32)

    @pl.when(k == pl.num_programs(1) - 1)
    def _():
        dec_out_ref[...] = (acc_ref[...] + dec_b).astype(dec_out_ref.dtype)


def prepare_sae_params(enc_w, enc_b, dec_w, dec_b, *,
                       compute_dtype=jnp.bfloat16):
    """One-time weight prep: pad, cast, pre-transpose, pick hidden-dim tiling.

    enc_w: (D_hid, D_in), dec_w: (D_in, D_hid)  (PyTorch nn.Linear layout).
    Keep the returned dict in model state and reuse it across forward calls.
    """
    D_hid, D_in = enc_w.shape
    assert dec_w.shape == (D_in, D_hid)

    d_in_p = _round_up(D_in, 128)
    d_hid_128 = _round_up(D_hid, 128)

    # Pick the hidden-dim tile so the two streamed weight blocks use at most
    # ~half the per-core VMEM cap (leaves room for x / output / acc tiles).
    cap = _vmem_cap_bytes()
    w_itemsize = jnp.dtype(compute_dtype).itemsize
    weight_budget = max(cap // 2, 4 << 20)
    tk_max = max(128, (weight_budget // (2 * d_in_p * w_itemsize)) // 128 * 128)
    if d_hid_128 <= tk_max:
        nk, tk = 1, d_hid_128
    else:
        nk = _cdiv(d_hid_128, tk_max)
        tk = _round_up(_cdiv(d_hid_128, nk), 128)
    d_hid_p = nk * tk

    # Padded + cast + pre-transposed copies (materialized once, not per call).
    enc_w_p = jnp.zeros((d_in_p, d_hid_p), compute_dtype).at[:D_in, :D_hid].set(
        enc_w.T.astype(compute_dtype))
    dec_w_p = jnp.zeros((d_hid_p, d_in_p), compute_dtype).at[:D_hid, :D_in].set(
        dec_w.T.astype(compute_dtype))
    enc_b_p = jnp.zeros((1, d_hid_p), jnp.float32).at[0, :D_hid].set(
        enc_b.astype(jnp.float32))
    dec_b_p = jnp.zeros((1, d_in_p), jnp.float32).at[0, :D_in].set(
        dec_b.astype(jnp.float32))

    return dict(input_dim=D_in, hidden_dim=D_hid,
                d_in_p=d_in_p, d_hid_p=d_hid_p, tk=tk, nk=nk,
                compute_dtype=compute_dtype,
                enc_w=enc_w_p, enc_b=enc_b_p, dec_w=dec_w_p, dec_b=dec_b_p)


def enhanced_sae_forward(x, params, *, block_rows=512,
                         enc_out_dtype=None, dec_out_dtype=jnp.float32):
    """x: (B, D_in).  params: output of prepare_sae_params."""
    B, D_in = x.shape
    assert D_in == params["input_dim"]
    D_hid = params["hidden_dim"]
    d_in_p, d_hid_p = params["d_in_p"], params["d_hid_p"]
    tk, nk = params["tk"], params["nk"]
    compute_dtype = params["compute_dtype"]
    if enc_out_dtype is None:
        enc_out_dtype = compute_dtype  # bf16 by default -> half the writeback

    # 16-sublane aligned batch tile (keeps bf16 output tiles unmasked).
    tm = min(_round_up(block_rows, 16), _round_up(B, 16))
    b_p = _round_up(B, tm)

    x_p = x
    if (b_p, d_in_p) != (B, D_in):
        x_p = jnp.zeros((b_p, d_in_p), x.dtype).at[:B, :D_in].set(x)

    single_buffer_weights = (nk == 1)  # constant block index -> 1 buffer is enough
    grid = (b_p // tm, nk)

    def run(single_buffer):
        # VMEM budget for the chosen tiles (+ compiler-managed intermediates).
        x_bytes = jnp.dtype(x.dtype).itemsize
        w_bytes = jnp.dtype(compute_dtype).itemsize
        eo_bytes = jnp.dtype(enc_out_dtype).itemsize
        do_bytes = jnp.dtype(dec_out_dtype).itemsize
        w_buf = 1 if (single_buffer and hasattr(pl, "Buffered")) else 2
        tile_bytes = (
            2 * tm * d_in_p * x_bytes                 # x tiles (double-buffered)
            + w_buf * d_in_p * tk * w_bytes           # encoder weight block(s)
            + w_buf * tk * d_in_p * w_bytes           # decoder weight block(s)
            + w_buf * (tk + d_in_p) * 4               # biases (f32)
            + 2 * tm * tk * eo_bytes                  # encoded tiles
            + 2 * tm * d_in_p * do_bytes              # decoded tiles
            + tm * d_in_p * 4                         # f32 accumulator scratch
            + tm * d_in_p * (w_bytes + 4)             # x_centered + finalize temp
            + tm * tk * (4 + w_bytes))                # pre (f32) + encoded temp
        cap = _vmem_cap_bytes()
        vmem_limit = max(min(int(tile_bytes * 1.5) + (2 << 20), cap), 16 << 20)

        in_specs = [
            pl.BlockSpec((tm, d_in_p), lambda i, k: (i, 0)),                 # x
            _maybe_single_buffer_spec((d_in_p, tk), lambda i, k: (0, k),
                                      single_buffer),                        # enc_w
            _maybe_single_buffer_spec((1, tk), lambda i, k: (0, k),
                                      single_buffer),                        # enc_b
            _maybe_single_buffer_spec((tk, d_in_p), lambda i, k: (k, 0),
                                      single_buffer),                        # dec_w
            _maybe_single_buffer_spec((1, d_in_p), lambda i, k: (0, 0),
                                      single_buffer),                        # dec_b
        ]
        out_specs = (
            pl.BlockSpec((tm, tk), lambda i, k: (i, k)),                     # encoded
            pl.BlockSpec((tm, d_in_p), lambda i, k: (i, 0)),                 # decoded
        )

        return pl.pallas_call(
            functools.partial(_sae_kernel, compute_dtype=compute_dtype),
            out_shape=(
                jax.ShapeDtypeStruct((b_p, d_hid_p), enc_out_dtype),
                jax.ShapeDtypeStruct((b_p, d_in_p), dec_out_dtype),
            ),
            grid=grid,
            in_specs=in_specs,
            out_specs=out_specs,
            scratch_shapes=[pltpu.VMEM((tm, d_in_p), jnp.float32)],
            compiler_params=pltpu.CompilerParams(
                dimension_semantics=("parallel", "arbitrary"),
                vmem_limit_bytes=vmem_limit),
        )(x_p, params["enc_w"], params["enc_b"], params["dec_w"], params["dec_b"])

    try:
        encoded_p, decoded_p = run(single_buffer_weights)
    except Exception:
        if not single_buffer_weights:
            raise
        # Fallback: some jax versions may reject Buffered(1); use default 2-deep.
        encoded_p, decoded_p = run(False)

    # Slice padding back off.
    return encoded_p[:B, :D_hid], decoded_p[:B, :D_in]


def compute_loss(x, decoded, encoded, l1_coeff=0.1):
    """Host-side equivalent of EnhancedSAE.compute_loss (plain jnp, not a kernel)."""
    recon = jnp.mean((decoded.astype(jnp.float32) - x.astype(jnp.float32)) ** 2)
    l1 = l1_coeff * jnp.sum(jnp.abs(encoded.astype(jnp.float32)))
    return recon + l1


def init_params(input_dim=64, hidden_dim=32, seed=0):
    """Deterministic kaiming_uniform_(a=sqrt(5)) equivalent; biases zeroed."""
    key = jax.random.PRNGKey(seed)
    k_enc, k_dec = jax.random.split(key)
    enc_bound = 1.0 / math.sqrt(input_dim)
    dec_bound = 1.0 / math.sqrt(hidden_dim)
    enc_w = jax.random.uniform(k_enc, (hidden_dim, input_dim),
                               jnp.float32, -enc_bound, enc_bound)
    dec_w = jax.random.uniform(k_dec, (input_dim, hidden_dim),
                               jnp.float32, -dec_bound, dec_bound)
    enc_b = jnp.zeros((hidden_dim,), jnp.float32)
    dec_b = jnp.zeros((input_dim,), jnp.float32)
    return enc_w, enc_b, dec_w, dec_b


def reference_forward(x, enc_w, enc_b, dec_w, dec_b):
    hi = jax.lax.Precision.HIGHEST
    x_centered = x - dec_b
    encoded = jnp.maximum(jnp.dot(x_centered, enc_w.T, precision=hi) + enc_b, 0.0)
    decoded = jnp.dot(encoded, dec_w.T, precision=hi) + dec_b
    return encoded, decoded


if __name__ == "__main__":
    # TODO(synk): activation caching / clear_cache is host-side Python state;
    # the kernel returns both tensors so the caller can append them to a cache.
    input_dim, hidden_dim, batch = 64, 32, 8
    enc_w, enc_b, dec_w, dec_b = init_params(input_dim, hidden_dim, seed=0)
    x = jax.random.normal(jax.random.PRNGKey(0), (batch, input_dim), jnp.float32)

    # Production configuration: bf16 MXU operands + bf16 encoded writeback,
    # f32 accumulation.  Weights prepared once and reused.
    params_bf16 = prepare_sae_params(enc_w, enc_b, dec_w, dec_b,
                                     compute_dtype=jnp.bfloat16)
    enc_bf16, dec_bf16 = enhanced_sae_forward(x, params_bf16)
    jax.block_until_ready((enc_bf16, dec_bf16))

    # Full-f32 path for a tight semantic check against the reference.
    params_f32 = prepare_sae_params(enc_w, enc_b, dec_w, dec_b,
                                    compute_dtype=jnp.float32)
    enc_f32, dec_f32 = enhanced_sae_forward(x, params_f32,
                                            enc_out_dtype=jnp.float32)
    jax.block_until_ready((enc_f32, dec_f32))

    enc_ref, dec_ref = reference_forward(x, enc_w, enc_b, dec_w, dec_b)

    assert enc_bf16.shape == (batch, hidden_dim)
    assert dec_bf16.shape == (batch, input_dim)
    assert jnp.allclose(enc_f32, enc_ref, atol=1e-4, rtol=1e-4)
    assert jnp.allclose(dec_f32, dec_ref, atol=1e-4, rtol=1e-4)
    assert jnp.allclose(enc_bf16.astype(jnp.float32), enc_ref, atol=5e-2, rtol=5e-2)
    assert jnp.allclose(dec_bf16.astype(jnp.float32), dec_ref, atol=5e-2, rtol=5e-2)

    loss = compute_loss(x, dec_f32, enc_f32, l1_coeff=0.1)
    jax.block_until_ready(loss)

    print("KERNEL_OK")
</pallas_src>

<mosaic_0001>
module attributes {stable_mosaic.version = 11 : i64} {
  func.func @_sae_kernel(%arg0: i32, %arg1: i32, %arg2: memref<16x128xf32, #tpu.memory_space<vmem>>, %arg3: memref<128x128xbf16, #tpu.memory_space<vmem>>, %arg4: memref<1x128xf32, #tpu.memory_space<vmem>>, %arg5: memref<128x128xbf16, #tpu.memory_space<vmem>>, %arg6: memref<1x128xf32, #tpu.memory_space<vmem>>, %arg7: memref<16x128xbf16, #tpu.memory_space<vmem>>, %arg8: memref<16x128xf32, #tpu.memory_space<vmem>>, %arg9: memref<16x128xf32, #tpu.memory_space<vmem>>) attributes {dimension_semantics = [#tpu.dimension_semantics<parallel>, #tpu.dimension_semantics<arbitrary>], iteration_bounds = array<i64: 1, 1>, scalar_prefetch = 0 : i64, scratch_operands = 1 : i64, tpu.core_type = #tpu.core_type<tc>, window_params = [{transform_indices = @transform_0, window_bounds = array<i64: 16, 128>}, {pipeline_mode = #tpu.pipeline_mode<synchronous>, transform_indices = @transform_1, window_bounds = array<i64: 128, 128>}, {pipeline_mode = #tpu.pipeline_mode<synchronous>, transform_indices = @transform_2, window_bounds = array<i64: 1, 128>}, {pipeline_mode = #tpu.pipeline_mode<synchronous>, transform_indices = @transform_3, window_bounds = array<i64: 128, 128>}, {pipeline_mode = #tpu.pipeline_mode<synchronous>, transform_indices = @transform_4, window_bounds = array<i64: 1, 128>}, {transform_indices = @transform_5, window_bounds = array<i64: 16, 128>}, {transform_indices = @transform_6, window_bounds = array<i64: 16, 128>}]} {
    %c0_i32 = arith.constant 0 : i32
    %0 = arith.cmpi eq, %arg1, %c0_i32 : i32
    %1 = arith.extui %0 : i1 to i32
    %c0_i32_0 = arith.constant 0 : i32
    %2 = arith.cmpi ne, %1, %c0_i32_0 : i32
    scf.if %2 {
      %cst_20 = arith.constant 0.000000e+00 : f32
      %25 = vector.broadcast %cst_20 : f32 to vector<16x128xf32>
      %c0_21 = arith.constant 0 : index
      %c0_22 = arith.constant 0 : index
      %26 = vector.load %arg9[%c0_21, %c0_22] : memref<16x128xf32, #tpu.memory_space<vmem>>, vector<16x128xf32>
      tpu.vector_store %arg9[%c0_21, %c0_22], %25 {strides = array<i32>} : memref<16x128xf32, #tpu.memory_space<vmem>>, vector<16x128xf32>,
    } else {
    }
    %c0 = arith.constant 0 : index
    %c0_1 = arith.constant 0 : index
    %3 = vector.load %arg6[%c0, %c0_1] : memref<1x128xf32, #tpu.memory_space<vmem>>, vector<1x128xf32>
    %c0_2 = arith.constant 0 : index
    %c0_3 = arith.constant 0 : index
    %4 = vector.load %arg2[%c0_2, %c0_3] : memref<16x128xf32, #tpu.memory_space<vmem>>, vector<16x128xf32>
    %5 = vector.broadcast %3 : vector<1x128xf32> to vector<16x128xf32>
    %6 = arith.subf %4, %5 : vector<16x128xf32>
    %7 = arith.truncf %6 : vector<16x128xf32> to vector<16x128xbf16>
    %c0_4 = arith.constant 0 : index
    %c0_5 = arith.constant 0 : index
    %8 = vector.load %arg3[%c0_4, %c0_5] : memref<128x128xbf16, #tpu.memory_space<vmem>>, vector<128x128xbf16>
    %cst = arith.constant dense<0.000000e+00> : vector<16x128xf32>
    %9 = tpu.matmul %7, %8, %cst {dimension_numbers = #tpu.dot_dimension_numbers<[1], [0], [0], [1], [0, 0, 1, 1], [], []>} : vector<16x128xbf16>, vector<128x128xbf16>, vector<16x128xf32> -> vector<16x128xf32>
    %c0_6 = arith.constant 0 : index
    %c0_7 = arith.constant 0 : index
    %10 = vector.load %arg4[%c0_6, %c0_7] : memref<1x128xf32, #tpu.memory_space<vmem>>, vector<1x128xf32>
    %11 = vector.broadcast %10 : vector<1x128xf32> to vector<16x128xf32>
    %12 = arith.addf %9, %11 : vector<16x128xf32>
    %cst_8 = arith.constant 0.000000e+00 : f32
    %13 = vector.broadcast %cst_8 : f32 to vector<16x128xf32>
    %14 = arith.maximumf %12, %13 : vector<16x128xf32>
    %15 = arith.truncf %14 : vector<16x128xf32> to vector<16x128xbf16>
    %c0_9 = arith.constant 0 : index
    %c0_10 = arith.constant 0 : index
    %16 = vector.load %arg7[%c0_9, %c0_10] : memref<16x128xbf16, #tpu.memory_space<vmem>>, vector<16x128xbf16>
    tpu.vector_store %arg7[%c0_9, %c0_10], %15 {strides = array<i32>} : memref<16x128xbf16, #tpu.memory_space<vmem>>, vector<16x128xbf16>,
    %c0_11 = arith.constant 0 : index
    %c0_12 = arith.constant 0 : index
    %17 = vector.load %arg9[%c0_11, %c0_12] : memref<16x128xf32, #tpu.memory_space<vmem>>, vector<16x128xf32>
    %c0_13 = arith.constant 0 : index
    %c0_14 = arith.constant 0 : index
    %18 = vector.load %arg5[%c0_13, %c0_14] : memref<128x128xbf16, #tpu.memory_space<vmem>>, vector<128x128xbf16>
    %cst_15 = arith.constant dense<0.000000e+00> : vector<16x128xf32>
    %19 = tpu.matmul %15, %18, %cst_15 {dimension_numbers = #tpu.dot_dimension_numbers<[1], [0], [0], [1], [0, 0, 1, 1], [], []>} : vector<16x128xbf16>, vector<128x128xbf16>, vector<16x128xf32> -> vector<16x128xf32>
    %20 = arith.addf %17, %19 : vector<16x128xf32>
    %c0_16 = arith.constant 0 : index
    %c0_17 = arith.constant 0 : index
    %21 = vector.load %arg9[%c0_16, %c0_17] : memref<16x128xf32, #tpu.memory_space<vmem>>, vector<16x128xf32>
    tpu.vector_store %arg9[%c0_16, %c0_17], %20 {strides = array<i32>} : memref<16x128xf32, #tpu.memory_space<vmem>>, vector<16x128xf32>,
    %c0_i32_18 = arith.constant 0 : i32
    %22 = arith.cmpi eq, %arg1, %c0_i32_18 : i32
    %23 = arith.extui %22 : i1 to i32
    %c0_i32_19 = arith.constant 0 : i32
    %24 = arith.cmpi ne, %23, %c0_i32_19 : i32
    scf.if %24 {
      %c0_20 = arith.constant 0 : index
      %c0_21 = arith.constant 0 : index
      %25 = vector.load %arg9[%c0_20, %c0_21] : memref<16x128xf32, #tpu.memory_space<vmem>>, vector<16x128xf32>
      %26 = vector.broadcast %3 : vector<1x128xf32> to vector<16x128xf32>
      %27 = arith.addf %25, %26 : vector<16x128xf32>
      %c0_22 = arith.constant 0 : index
      %c0_23 = arith.constant 0 : index
      %28 = vector.load %arg8[%c0_22, %c0_23] : memref<16x128xf32, #tpu.memory_space<vmem>>, vector<16x128xf32>
      tpu.vector_store %arg8[%c0_22, %c0_23], %27 {strides = array<i32>} : memref<16x128xf32, #tpu.memory_space<vmem>>, vector<16x128xf32>,
    } else {
    }
    return
  }
  func.func @transform_0(%arg0: i32, %arg1: i32) -> (i32, i32) {
    %c0_i32 = arith.constant 0 : i32
    %c0_i32_0 = arith.constant 0 : i32
    return %arg0, %c0_i32 : i32, i32
  }
  func.func @transform_1(%arg0: i32, %arg1: i32) -> (i32, i32) {
    %c0_i32 = arith.constant 0 : i32
    %c0_i32_0 = arith.constant 0 : i32
    return %c0_i32, %arg1 : i32, i32
  }
  func.func @transform_2(%arg0: i32, %arg1: i32) -> (i32, i32) {
    %c0_i32 = arith.constant 0 : i32
    %c0_i32_0 = arith.constant 0 : i32
    return %c0_i32, %arg1 : i32, i32
  }
  func.func @transform_3(%arg0: i32, %arg1: i32) -> (i32, i32) {
    %c0_i32 = arith.constant 0 : i32
    %c0_i32_0 = arith.constant 0 : i32
    return %arg1, %c0_i32 : i32, i32
  }
  func.func @transform_4(%arg0: i32, %arg1: i32) -> (i32, i32) {
    %c0_i32 = arith.constant 0 : i32
    %c0_i32_0 = arith.constant 0 : i32
    %c0_i32_1 = arith.constant 0 : i32
    return %c0_i32, %c0_i32_0 : i32, i32
  }
  func.func @transform_5(%arg0: i32, %arg1: i32) -> (i32, i32) {
    %c0_i32 = arith.constant 0 : i32
    return %arg0, %arg1 : i32, i32
  }
  func.func @transform_6(%arg0: i32, %arg1: i32) -> (i32, i32) {
    %c0_i32 = arith.constant 0 : i32
    %c0_i32_0 = arith.constant 0 : i32
    return %arg0, %c0_i32 : i32, i32
  }
}

module attributes {stable_mosaic.version = 11 : i64} {
  func.func @_sae_kernel(%arg0: i32, %arg1: i32, %arg2: memref<16x128xf32, #tpu.memory_space<vmem>>, %arg3: memref<128x128xbf16, #tpu.memory_space<vmem>>, %arg4: memref<1x128xf32, #tpu.memory_space<vmem>>, %arg5: memref<128x128xbf16, #tpu.memory_space<vmem>>, %arg6: memref<1x128xf32, #tpu.memory_space<vmem>>, %arg7: memref<16x128xbf16, #tpu.memory_space<vmem>>, %arg8: memref<16x128xf32, #tpu.memory_space<vmem>>, %arg9: memref<16x128xf32, #tpu.memory_space<vmem>>) attributes {dimension_semantics = [#tpu.dimension_semantics<parallel>, #tpu.dimension_semantics<arbitrary>], iteration_bounds = array<i64: 1, 1>, scalar_prefetch = 0 : i64, scratch_operands = 1 : i64, tpu.core_type = #tpu.core_type<tc>, window_params = [{transform_indices = @transform_0, window_bounds = array<i64: 16, 128>}, {transform_indices = @transform_1, window_bounds = array<i64: 128, 128>}, {transform_indices = @transform_2, window_bounds = array<i64: 1, 128>}, {transform_indices = @transform_3, window_bounds = array<i64: 128, 128>}, {pipeline_mode = #tpu.pipeline_mode<synchronous>, transform_indices = @transform_4, window_bounds = array<i64: 1, 128>}, {transform_indices = @transform_5, window_bounds = array<i64: 16, 128>}, {transform_indices = @transform_6, window_bounds = array<i64: 16, 128>}]} {
    %c0_i32 = arith.constant 0 : i32
    %0 = arith.cmpi eq, %arg1, %c0_i32 : i32
    %1 = arith.extui %0 : i1 to i32
    %c0_i32_0 = arith.constant 0 : i32
    %2 = arith.cmpi ne, %1, %c0_i32_0 : i32
    scf.if %2 {
      %cst_20 = arith.constant 0.000000e+00 : f32
      %25 = vector.broadcast %cst_20 : f32 to vector<16x128xf32>
      %c0_21 = arith.constant 0 : index
      %c0_22 = arith.constant 0 : index
      %26 = vector.load %arg9[%c0_21, %c0_22] : memref<16x128xf32, #tpu.memory_space<vmem>>, vector<16x128xf32>
      tpu.vector_store %arg9[%c0_21, %c0_22], %25 {strides = array<i32>} : memref<16x128xf32, #tpu.memory_space<vmem>>, vector<16x128xf32>,
    } else {
    }
    %c0 = arith.constant 0 : index
    %c0_1 = arith.constant 0 : index
    %3 = vector.load %arg6[%c0, %c0_1] : memref<1x128xf32, #tpu.memory_space<vmem>>, vector<1x128xf32>
    %c0_2 = arith.constant 0 : index
    %c0_3 = arith.constant 0 : index
    %4 = vector.load %arg2[%c0_2, %c0_3] : memref<16x128xf32, #tpu.memory_space<vmem>>, vector<16x128xf32>
    %5 = vector.broadcast %3 : vector<1x128xf32> to vector<16x128xf32>
    %6 = arith.subf %4, %5 : vector<16x128xf32>
    %7 = arith.truncf %6 : vector<16x128xf32> to vector<16x128xbf16>
    %c0_4 = arith.constant 0 : index
    %c0_5 = arith.constant 0 : index
    %8 = vector.load %arg3[%c0_4, %c0_5] : memref<128x128xbf16, #tpu.memory_space<vmem>>, vector<128x128xbf16>
    %cst = arith.constant dense<0.000000e+00> : vector<16x128xf32>
    %9 = tpu.matmul %7, %8, %cst {dimension_numbers = #tpu.dot_dimension_numbers<[1], [0], [0], [1], [0, 0, 1, 1], [], []>} : vector<16x128xbf16>, vector<128x128xbf16>, vector<16x128xf32> -> vector<16x128xf32>
    %c0_6 = arith.constant 0 : index
    %c0_7 = arith.constant 0 : index
    %10 = vector.load %arg4[%c0_6, %c0_7] : memref<1x128xf32, #tpu.memory_space<vmem>>, vector<1x128xf32>
    %11 = vector.broadcast %10 : vector<1x128xf32> to vector<16x128xf32>
    %12 = arith.addf %9, %11 : vector<16x128xf32>
    %cst_8 = arith.constant 0.000000e+00 : f32
    %13 = vector.broadcast %cst_8 : f32 to vector<16x128xf32>
    %14 = arith.maximumf %12, %13 : vector<16x128xf32>
    %15 = arith.truncf %14 : vector<16x128xf32> to vector<16x128xbf16>
    %c0_9 = arith.constant 0 : index
    %c0_10 = arith.constant 0 : index
    %16 = vector.load %arg7[%c0_9, %c0_10] : memref<16x128xbf16, #tpu.memory_space<vmem>>, vector<16x128xbf16>
    tpu.vector_store %arg7[%c0_9, %c0_10], %15 {strides = array<i32>} : memref<16x128xbf16, #tpu.memory_space<vmem>>, vector<16x128xbf16>,
    %c0_11 = arith.constant 0 : index
    %c0_12 = arith.constant 0 : index
    %17 = vector.load %arg9[%c0_11, %c0_12] : memref<16x128xf32, #tpu.memory_space<vmem>>, vector<16x128xf32>
    %c0_13 = arith.constant 0 : index
    %c0_14 = arith.constant 0 : index
    %18 = vector.load %arg5[%c0_13, %c0_14] : memref<128x128xbf16, #tpu.memory_space<vmem>>, vector<128x128xbf16>
    %cst_15 = arith.constant dense<0.000000e+00> : vector<16x128xf32>
    %19 = tpu.matmul %15, %18, %cst_15 {dimension_numbers = #tpu.dot_dimension_numbers<[1], [0], [0], [1], [0, 0, 1, 1], [], []>} : vector<16x128xbf16>, vector<128x128xbf16>, vector<16x128xf32> -> vector<16x128xf32>
    %20 = arith.addf %17, %19 : vector<16x128xf32>
    %c0_16 = arith.constant 0 : index
    %c0_17 = arith.constant 0 : index
    %21 = vector.load %arg9[%c0_16, %c0_17] : memref<16x128xf32, #tpu.memory_space<vmem>>, vector<16x128xf32>
    tpu.vector_store %arg9[%c0_16, %c0_17], %20 {strides = array<i32>} : memref<16x128xf32, #tpu.memory_space<vmem>>, vector<16x128xf32>,
    %c0_i32_18 = arith.constant 0 : i32
    %22 = arith.cmpi eq, %arg1, %c0_i32_18 : i32
    %23 = arith.extui %22 : i1 to i32
    %c0_i32_19 = arith.constant 0 : i32
    %24 = arith.cmpi ne, %23, %c0_i32_19 : i32
    scf.if %24 {
      %c0_20 = arith.constant 0 : index
      %c0_21 = arith.constant 0 : index
      %25 = vector.load %arg9[%c0_20, %c0_21] : memref<16x128xf32, #tpu.memory_space<vmem>>, vector<16x128xf32>
      %26 = vector.broadcast %3 : vector<1x128xf32> to vector<16x128xf32>
      %27 = arith.addf %25, %26 : vector<16x128xf32>
      %c0_22 = arith.constant 0 : index
      %c0_23 = arith.constant 0 : index
      %28 = vector.load %arg8[%c0_22, %c0_23] : memref<16x128xf32, #tpu.memory_space<vmem>>, vector<16x128xf32>
      tpu.vector_store %arg8[%c0_22, %c0_23], %27 {strides = array<i32>} : memref<16x128xf32, #tpu.memory_space<vmem>>, vector<16x128xf32>,
    } else {
    }
    return
  }
  func.func @transform_0(%arg0: i32, %arg1: i32) -> (i32, i32) {
    %c0_i32 = arith.constant 0 : i32
    %c0_i32_0 = arith.constant 0 : i32
    return %arg0, %c0_i32 : i32, i32
  }
  func.func @transform_1(%arg0: i32, %arg1: i32) -> (i32, i32) {
    %c0_i32 = arith.constant 0 : i32
    %c0_i32_0 = arith.constant 0 : i32
    return %c0_i32, %arg1 : i32, i32
  }
  func.func @transform_2(%arg0: i32, %arg1: i32) -> (i32, i32) {
    %c0_i32 = arith.constant 0 : i32
    %c0_i32_0 = arith.constant 0 : i32
    return %c0_i32, %arg1 : i32, i32
  }
  func.func @transform_3(%arg0: i32, %arg1: i32) -> (i32, i32) {
    %c0_i32 = arith.constant 0 : i32
    %c0_i32_0 = arith.constant 0 : i32
    return %arg1, %c0_i32 : i32, i32
  }
  func.func @transform_4(%arg0: i32, %arg1: i32) -> (i32, i32) {
    %c0_i32 = arith.constant 0 : i32
    %c0_i32_0 = arith.constant 0 : i32
    %c0_i32_1 = arith.constant 0 : i32
    return %c0_i32, %c0_i32_0 : i32, i32
  }
  func.func @transform_5(%arg0: i32, %arg1: i32) -> (i32, i32) {
    %c0_i32 = arith.constant 0 : i32
    return %arg0, %arg1 : i32, i32
  }
  func.func @transform_6(%arg0: i32, %arg1: i32) -> (i32, i32) {
    %c0_i32 = arith.constant 0 : i32
    %c0_i32_0 = arith.constant 0 : i32
    return %arg0, %c0_i32 : i32, i32
  }
}

</mosaic_0001>

<bundles_post_ra>
// kernel: tpu_custom_call.1
= control target key start
LH: loop header
LB: loop body
LE: loop exit
PB: predicated region body
PF: predicated region fallthrough
CT: control target
= control target key end

     0   :  { %12 = vsyncpa [#allocation4], 0  ;;  %s664_s0 = inlined_call_operand.hbm [shape: f32[16,128], index: 0, kind: input, shape index: {}]   ;;  %s665_s1 = inlined_call_operand.hbm [shape: bf16[128,128], index: 1, kind: input, shape index: {}]   ;;  %s666_s2 = inlined_call_operand.vmem [shape: f32[1,128], index: 2, kind: input, shape index: {}]   ;;  %s667_s3 = inlined_call_operand.hbm [shape: bf16[128,128], index: 3, kind: input, shape index: {}]   ;;  %s668_s4 = inlined_call_operand.vmem [shape: f32[1,128], index: 4, kind: input, shape index: {}]   ;;  %s669_s5 = inlined_call_operand.hbm [shape: bf16[16,128], index: 5, kind: output, shape index: {0}]   ;;  %s670_s6 = inlined_call_operand.hbm [shape: f32[16,128], index: 6, kind: output, shape index: {1}]  }
   0x1   :  { %13 = vsyncpa [#allocation7], 0 }
   0x2   :  { %14 = vsyncpa [#allocation5], 0 }
   0x3   :  { %15 = vsyncpa [#allocation11], 0  ;;  %s582_s21 = smov [#allocation6]  }
   0x4   :  { %s33_s22 = sshll.u32 %s582_s21, 4  ;;  %s34_s22 = int_to_ptr.vmem [resolvable:$true] %s33_s22 }
   0x5   :  { %s482_s23 = scalar_lea.vmem %s34_s22, 1024  ;;  %p487_p1 = scmp.lt.s32.totalorder %s34_s22, %s34_s22 }
   0x6   :  { %p483_p0 = scmp.ne.s32.totalorder %s34_s22, %s482_s23  ;;  %p488_p2 = scmp.lt.s32.totalorder %s482_s23, %s482_s23 }
   0x8   :  { %p489_p3 = por %p488_p2, %p487_p1 }
   0xa   :  { %p490_p4 = pnand %p489_p3, %p483_p0 }
   0xc   :  { %493 = shalt.err (!%p490_p4)
}
   0xd   :  { %s583_s24 = smov 64   ;;  %s584_s25 = smov 4  }
   0xe   :  { %39 = dma.hbm_to_vmem [thread:$0]  %s665_s1, 1024, %s34_s22, [#allocation7], %s583_s24, %s583_s24, %s584_s25  }
   0xf   :  { %s585_s28 = smov [#allocation3]  }
  0x10   :  { %s21_s29 = sshll.u32 %s585_s28, 4  ;;  %s22_s29 = int_to_ptr.vmem [resolvable:$true] %s21_s29 }
  0x11   :  { %s502_s30 = scalar_lea.vmem %s22_s29, 256  ;;  %p507_p6 = scmp.lt.s32.totalorder %s22_s29, %s22_s29 }
  0x12   :  { %p503_p5 = scmp.ne.s32.totalorder %s22_s29, %s502_s30  ;;  %p508_p7 = scmp.lt.s32.totalorder %s502_s30, %s502_s30 }
  0x14   :  { %p509_p8 = por %p508_p7, %p507_p6 }
  0x16   :  { %p510_p9 = pnand %p509_p8, %p503_p5 }
  0x18   :  { %513 = shalt.err (!%p510_p9)
}
  0x19   :  { %s586_s7 = smov 128   ;;  %s587_s8 = smov 8  }
  0x1a   :  { %27 = dma.hbm_to_vmem [thread:$0]  %s664_s0, 256, %s22_s29, [#allocation4], %s586_s7, %s586_s7, %s587_s8  }
  0x1b   :  { %s588_s1 = smov [#allocation8]  }
  0x1c   :  { %s47_s11 = sshll.u32 %s588_s1, 4  ;;  %s48_s11 = int_to_ptr.vmem [resolvable:$true] %s47_s11 }
  0x1d   :  { %s522_s12 = scalar_lea.vmem %s48_s11, 1024  ;;  %p527_p11 = scmp.lt.s32.totalorder %s48_s11, %s48_s11 }
  0x1e   :  { %p523_p10 = scmp.ne.s32.totalorder %s48_s11, %s522_s12  ;;  %p528_p12 = scmp.lt.s32.totalorder %s522_s12, %s522_s12 }
  0x20   :  { %p529_p13 = por %p528_p12, %p527_p11 }
  0x22   :  { %p530_p0 = pnand %p529_p13, %p523_p10 }
  0x24   :  { %533 = shalt.err (!%p530_p0)
}
  0x25   :  { %53 = dma.hbm_to_vmem [thread:$0]  %s667_s3, 1024, %s48_s11, [#allocation7], %s583_s24, %s583_s24, %s584_s25  }
  0x26   :  { %574 = dma.done.wait [#allocation4], 256  }
  0x27   :  { %575 = vsyncadd [#allocation4], 4294967040 }
  0x28   :  { %576 = dma.done.wait [#allocation7], 2048  }
  0x29   :  { %577 = vsyncadd [#allocation7], 4294965248  ;;  %v589_v0 = vmov 0.0   ;;  %vm590_vm0 = vmmov 0   ;;  %v458_v1 = vld [vmem:[#allocation6 + $0x38] sm:$0xff]   ;;  %v459_v2 = vld [vmem:[#allocation6 + $0x30] sm:$0xff]  }
  0x2a   :  { %407 = vmatprep.subr.bf16.mxu0 %v589_v0  ;;  %423 = vmatprep.mubr.msk.bf16.mxu0 %vm590_vm0, %v589_v0  ;;  %v460_v3 = vld [vmem:[#allocation6 + $0x28] sm:$0xff]   ;;  %v466_v4 = vld [vmem:[#allocation8 + $0x38] sm:$0xff]   ;;  %v461_v5 = vld [vmem:[#allocation6 + $0x20] sm:$0xff]   ;;  %s591_s16 = smov [#allocation9]  }
  0x2b   :  { %427 = vmatprep.subr.bf16.mxu1 %v589_v0  ;;  %443 = vmatprep.mubr.msk.bf16.mxu1 %vm590_vm0, %v589_v0  ;;  %v467_v6 = vld [vmem:[#allocation8 + $0x30] sm:$0xff]   ;;  %v462_v7 = vld [vmem:[#allocation6 + $0x18] sm:$0xff]   ;;  %v468_v8 = vld [vmem:[#allocation8 + $0x28] sm:$0xff]   ;;  %s333_s17 = sshll.u32 %s591_s16, 4  ;;  %s334_s17 = int_to_ptr.vmem [resolvable:$true] %s333_s17 }
  0x2c   :  { %408 = vmatpush3.bf16.msra.mxu0 %v458_v1  ;;  %428 = vmatpush3.bf16.msra.mxu1 %v466_v4  ;;  %v463_v9 = vld [vmem:[#allocation6 + $0x10] sm:$0xff]   ;;  %v469_v10 = vld [vmem:[#allocation8 + $0x20] sm:$0xff]   ;;  %v464_v11 = vld [vmem:[#allocation6 + $0x8] sm:$0xff]   ;;  %s534_s18 = scalar_lea.vmem %s334_s17, 128  ;;  %p539_p2 = scmp.lt.s32.totalorder %s334_s17, %s334_s17 }
  0x2d   :  { %409 = vmatprep.subr.bf16.mxu0 %v589_v0  ;;  %429 = vmatprep.subr.bf16.mxu1 %v589_v0  ;;  %v362_v12 = vld [vmem:[%s668_s4] ss:$0 sm:$0xff]  ;;  %v74_v14 = vld [vmem:[#allocation3 + $0x8] sm:$0xff]  ;;  %v465_v18 = vld [vmem:[#allocation6] sm:$0xff]   ;;  %p535_p1 = scmp.ne.s32.totalorder %s334_s17, %s534_s18  ;;  %p540_p3 = scmp.lt.s32.totalorder %s534_s18, %s534_s18 }
  0x2e   :  { %v73_v13 = vld [vmem:[#allocation3] sm:$0xff]  ;;  %v470_v15 = vld [vmem:[#allocation8 + $0x18] sm:$0xff]   ;;  %v82_v17 = vsub.f32 %v74_v14, %v362_v12  ;;  %v472_v21 = vld [vmem:[#allocation8 + $0x8] sm:$0xff]  }
  0x2f   :  { %v81_v16 = vsub.f32 %v73_v13, %v362_v12  ;;  %v471_v20 = vld [vmem:[#allocation8 + $0x10] sm:$0xff]   ;;  %v473_v22 = vld [vmem:[#allocation8] sm:$0xff]   ;;  %p541_p4 = por %p540_p3, %p539_p2 }
  0x30   :  { %410 = vmatpush3.bf16.msra.mxu0 %v459_v2  ;;  %430 = vmatpush3.bf16.msra.mxu1 %v467_v6  ;;  %v363_v23 = vld [vmem:[%s666_s2] ss:$0 sm:$0xff] }
  0x31   :  { %411 = vmatprep.subr.bf16.mxu0 %v589_v0  ;;  %431 = vmatprep.subr.bf16.mxu1 %v589_v0  ;;  %v83_v19 = vpack.c.bf16 %v82_v17, %v81_v16  ;;  %p542_p5 = pnand %p541_p4, %p535_p1 }
  0x34   :  { %412 = vmatpush3.bf16.msra.mxu0 %v460_v3  ;;  %432 = vmatpush3.bf16.msra.mxu1 %v468_v8 }
  0x35   :  { %413 = vmatprep.subr.bf16.mxu0 %v589_v0  ;;  %433 = vmatprep.subr.bf16.mxu1 %v589_v0 }
  0x38   :  { %414 = vmatpush3.bf16.msra.mxu0 %v461_v5  ;;  %434 = vmatpush3.bf16.msra.mxu1 %v469_v10 }
  0x39   :  { %415 = vmatprep.subr.bf16.mxu0 %v589_v0  ;;  %435 = vmatprep.subr.bf16.mxu1 %v589_v0 }
  0x3c   :  { %416 = vmatpush3.bf16.msra.mxu0 %v462_v7  ;;  %436 = vmatpush3.bf16.msra.mxu1 %v470_v15 }
  0x3d   :  { %417 = vmatprep.subr.bf16.mxu0 %v589_v0  ;;  %437 = vmatprep.subr.bf16.mxu1 %v589_v0 }
  0x40   :  { %418 = vmatpush3.bf16.msra.mxu0 %v463_v9  ;;  %438 = vmatpush3.bf16.msra.mxu1 %v471_v20 }
  0x41   :  { %419 = vmatprep.subr.bf16.mxu0 %v589_v0  ;;  %439 = vmatprep.subr.bf16.mxu1 %v589_v0 }
  0x44   :  { %420 = vmatpush3.bf16.msra.mxu0 %v464_v11  ;;  %440 = vmatpush3.bf16.msra.mxu1 %v472_v21 }
  0x45   :  { %421 = vmatprep.subr.bf16.mxu0 %v589_v0  ;;  %441 = vmatprep.subr.bf16.mxu1 %v589_v0 }
  0x48   :  { %422 = vmatpush3.bf16.msra.mxu0 %v465_v18  ;;  %442 = vmatpush3.bf16.msra.mxu1 %v473_v22 }
  0x4b   :  { %424 = vmatmul.mubr.bf16.vlgmr.msra.gmra.mxu0 %v83_v19 }
 0x10b   :  { %v189_v24 = vpop.f32.mrf.mxu0 }
 0x10c   :  { %v190_v26 = vadd.f32 %v363_v23, %v189_v24 }
 0x10d   :  { %v425_v25 = vpop.f32.mrf.mxu0 }
 0x10e   :  { %v196_v30 = vmax.f32 %v190_v26, 0.0 }
 0x10f   :  { %v192_v27 = vpop.f32.mrf.mxu0 }
 0x110   :  { %v193_v28 = vadd.f32 %v363_v23, %v192_v27 }
 0x111   :  { %v426_v29 = vpop.f32.mrf.mxu0 }
 0x112   :  { %v197_v31 = vmax.f32 %v193_v28, 0.0 }
 0x114   :  { %v198_v32 = vpack.c.bf16 %v197_v31, %v196_v30 }
 0x116   :  { %388 = vst [vmem:[#allocation9] sm:$0xff] %v198_v32   ;;  %444 = vmatmul.mubr.bf16.vlgmr.msra.gmra.mxu1 %v198_v32 }
 0x117   :  { %545 = shalt.err (!%p542_p5)
}
 0x118   :  { %339 = dma.vmem_to_hbm [thread:$0]  %s334_s17, 128, %s669_s5, [#allocation5], %s583_s24, %s583_s24, %s584_s25  }
 0x119   :  { %s592_s20 = smov [#allocation10]  }
 0x11a   :  { %s345_s21 = sshll.u32 %s592_s20, 4  ;;  %s346_s21 = int_to_ptr.vmem [resolvable:$true] %s345_s21 }
 0x11b   :  { %s554_s22 = scalar_lea.vmem %s346_s21, 256  ;;  %p559_p7 = scmp.lt.s32.totalorder %s346_s21, %s346_s21 }
 0x11c   :  { %p555_p6 = scmp.ne.s32.totalorder %s346_s21, %s554_s22  ;;  %p560_p8 = scmp.lt.s32.totalorder %s554_s22, %s554_s22 }
 0x11e   :  { %p561_p9 = por %p560_p8, %p559_p7 }
 0x120   :  { %p562_p10 = pnand %p561_p9, %p555_p6 }
 0x1d6   :  { %v308_v33 = vpop.f32.mrf.mxu1 }
 0x1d7   :  { %v324_v34 = vadd.f32 %v362_v12, %v308_v33 }
 0x1d8   :  { %v445_v35 = vpop.f32.mrf.mxu1 }
 0x1d9   :  { %326 = vst [vmem:[#allocation10] sm:$0xff] %v324_v34 }
 0x1da   :  { %v311_v36 = vpop.f32.mrf.mxu1 }
 0x1db   :  { %v325_v37 = vadd.f32 %v362_v12, %v311_v36 }
 0x1dc   :  { %v446_v38 = vpop.f32.mrf.mxu1 }
 0x1dd   :  { %327 = vst [vmem:[#allocation10 + $0x8] sm:$0xff] %v325_v37 }
 0x1de   :  { %565 = shalt.err (!%p562_p10)
}
 0x1df   :  { %351 = dma.vmem_to_hbm [thread:$0]  %s346_s21, 256, %s670_s6, [#allocation11], %s586_s7, %s586_s7, %s587_s8  }
 0x1e0   :  { %578 = dma.done.wait [#allocation5], 128  }
 0x1e1   :  { %579 = vsyncadd [#allocation5], 4294967168 }
 0x1e2   :  { %580 = dma.done.wait [#allocation11], 256  }
 0x1e3   :  { %581 = vsyncadd [#allocation11], 4294967040 }
 0x1e4   :  { %358 = vsyncpa [#allocation4], 1 }
 0x1e5   :  { %359 = vsyncpa [#allocation7], 1 }
 0x1e6   :  { %360 = vsyncpa [#allocation5], 1 }
 0x1e7   :  { %361 = vsyncpa [#allocation11], 1 }

// kernel: tpu_custom_call.1
= control target key start
LH: loop header
LB: loop body
LE: loop exit
PB: predicated region body
PF: predicated region fallthrough
CT: control target
= control target key end

     0   :  { %12 = vsyncpa [#allocation4], 0  ;;  %s664_s0 = inlined_call_operand.hbm [shape: f32[16,128], index: 0, kind: input, shape index: {}]   ;;  %s665_s1 = inlined_call_operand.hbm [shape: bf16[128,128], index: 1, kind: input, shape index: {}]   ;;  %s666_s2 = inlined_call_operand.vmem [shape: f32[1,128], index: 2, kind: input, shape index: {}]   ;;  %s667_s3 = inlined_call_operand.hbm [shape: bf16[128,128], index: 3, kind: input, shape index: {}]   ;;  %s668_s4 = inlined_call_operand.vmem [shape: f32[1,128], index: 4, kind: input, shape index: {}]   ;;  %s669_s5 = inlined_call_operand.hbm [shape: bf16[16,128], index: 5, kind: output, shape index: {0}]   ;;  %s670_s6 = inlined_call_operand.hbm [shape: f32[16,128], index: 6, kind: output, shape index: {1}]  }
   0x1   :  { %13 = vsyncpa [#allocation7], 0 }
   0x2   :  { %14 = vsyncpa [#allocation5], 0 }
   0x3   :  { %15 = vsyncpa [#allocation11], 0  ;;  %s582_s21 = smov [#allocation6]  }
   0x4   :  { %s33_s22 = sshll.u32 %s582_s21, 4  ;;  %s34_s22 = int_to_ptr.vmem [resolvable:$true] %s33_s22 }
   0x5   :  { %s482_s23 = scalar_lea.vmem %s34_s22, 1024  ;;  %p487_p1 = scmp.lt.s32.totalorder %s34_s22, %s34_s22 }
   0x6   :  { %p483_p0 = scmp.ne.s32.totalorder %s34_s22, %s482_s23  ;;  %p488_p2 = scmp.lt.s32.totalorder %s482_s23, %s482_s23 }
   0x8   :  { %p489_p3 = por %p488_p2, %p487_p1 }
   0xa   :  { %p490_p4 = pnand %p489_p3, %p483_p0 }
   0xc   :  { %493 = shalt.err (!%p490_p4)
}
   0xd   :  { %s583_s24 = smov 64   ;;  %s584_s25 = smov 4  }
   0xe   :  { %39 = dma.hbm_to_vmem [thread:$0]  %s665_s1, 1024, %s34_s22, [#allocation7], %s583_s24, %s583_s24, %s584_s25  }
   0xf   :  { %s585_s28 = smov [#allocation3]  }
  0x10   :  { %s21_s29 = sshll.u32 %s585_s28, 4  ;;  %s22_s29 = int_to_ptr.vmem [resolvable:$true] %s21_s29 }
  0x11   :  { %s502_s30 = scalar_lea.vmem %s22_s29, 256  ;;  %p507_p6 = scmp.lt.s32.totalorder %s22_s29, %s22_s29 }
  0x12   :  { %p503_p5 = scmp.ne.s32.totalorder %s22_s29, %s502_s30  ;;  %p508_p7 = scmp.lt.s32.totalorder %s502_s30, %s502_s30 }
  0x14   :  { %p509_p8 = por %p508_p7, %p507_p6 }
  0x16   :  { %p510_p9 = pnand %p509_p8, %p503_p5 }
  0x18   :  { %513 = shalt.err (!%p510_p9)
}
  0x19   :  { %s586_s7 = smov 128   ;;  %s587_s8 = smov 8  }
  0x1a   :  { %27 = dma.hbm_to_vmem [thread:$0]  %s664_s0, 256, %s22_s29, [#allocation4], %s586_s7, %s586_s7, %s587_s8  }
  0x1b   :  { %s588_s1 = smov [#allocation8]  }
  0x1c   :  { %s47_s11 = sshll.u32 %s588_s1, 4  ;;  %s48_s11 = int_to_ptr.vmem [resolvable:$true] %s47_s11 }
  0x1d   :  { %s522_s12 = scalar_lea.vmem %s48_s11, 1024  ;;  %p527_p11 = scmp.lt.s32.totalorder %s48_s11, %s48_s11 }
  0x1e   :  { %p523_p10 = scmp.ne.s32.totalorder %s48_s11, %s522_s12  ;;  %p528_p12 = scmp.lt.s32.totalorder %s522_s12, %s522_s12 }
  0x20   :  { %p529_p13 = por %p528_p12, %p527_p11 }
  0x22   :  { %p530_p0 = pnand %p529_p13, %p523_p10 }
  0x24   :  { %533 = shalt.err (!%p530_p0)
}
  0x25   :  { %53 = dma.hbm_to_vmem [thread:$0]  %s667_s3, 1024, %s48_s11, [#allocation7], %s583_s24, %s583_s24, %s584_s25  }
  0x26   :  { %574 = dma.done.wait [#allocation4], 256  }
  0x27   :  { %575 = vsyncadd [#allocation4], 4294967040 }
  0x28   :  { %576 = dma.done.wait [#allocation7], 2048  }
  0x29   :  { %577 = vsyncadd [#allocation7], 4294965248  ;;  %v589_v0 = vmov 0.0   ;;  %vm590_vm0 = vmmov 0   ;;  %v458_v1 = vld [vmem:[#allocation6 + $0x38] sm:$0xff]   ;;  %v459_v2 = vld [vmem:[#allocation6 + $0x30] sm:$0xff]  }
  0x2a   :  { %407 = vmatprep.subr.bf16.mxu0 %v589_v0  ;;  %423 = vmatprep.mubr.msk.bf16.mxu0 %vm590_vm0, %v589_v0  ;;  %v460_v3 = vld [vmem:[#allocation6 + $0x28] sm:$0xff]   ;;  %v466_v4 = vld [vmem:[#allocation8 + $0x38] sm:$0xff]   ;;  %v461_v5 = vld [vmem:[#allocation6 + $0x20] sm:$0xff]   ;;  %s591_s16 = smov [#allocation9]  }
  0x2b   :  { %427 = vmatprep.subr.bf16.mxu1 %v589_v0  ;;  %443 = vmatprep.mubr.msk.bf16.mxu1 %vm590_vm0, %v589_v0  ;;  %v467_v6 = vld [vmem:[#allocation8 + $0x30] sm:$0xff]   ;;  %v462_v7 = vld [vmem:[#allocation6 + $0x18] sm:$0xff]   ;;  %v468_v8 = vld [vmem:[#allocation8 + $0x28] sm:$0xff]   ;;  %s333_s17 = sshll.u32 %s591_s16, 4  ;;  %s334_s17 = int_to_ptr.vmem [resolvable:$true] %s333_s17 }
  0x2c   :  { %408 = vmatpush3.bf16.msra.mxu0 %v458_v1  ;;  %428 = vmatpush3.bf16.msra.mxu1 %v466_v4  ;;  %v463_v9 = vld [vmem:[#allocation6 + $0x10] sm:$0xff]   ;;  %v469_v10 = vld [vmem:[#allocation8 + $0x20] sm:$0xff]   ;;  %v464_v11 = vld [vmem:[#allocation6 + $0x8] sm:$0xff]   ;;  %s534_s18 = scalar_lea.vmem %s334_s17, 128  ;;  %p539_p2 = scmp.lt.s32.totalorder %s334_s17, %s334_s17 }
  0x2d   :  { %409 = vmatprep.subr.bf16.mxu0 %v589_v0  ;;  %429 = vmatprep.subr.bf16.mxu1 %v589_v0  ;;  %v362_v12 = vld [vmem:[%s668_s4] ss:$0 sm:$0xff]  ;;  %v74_v14 = vld [vmem:[#allocation3 + $0x8] sm:$0xff]  ;;  %v465_v18 = vld [vmem:[#allocation6] sm:$0xff]   ;;  %p535_p1 = scmp.ne.s32.totalorder %s334_s17, %s534_s18  ;;  %p540_p3 = scmp.lt.s32.totalorder %s534_s18, %s534_s18 }
  0x2e   :  { %v73_v13 = vld [vmem:[#allocation3] sm:$0xff]  ;;  %v470_v15 = vld [vmem:[#allocation8 + $0x18] sm:$0xff]   ;;  %v82_v17 = vsub.f32 %v74_v14, %v362_v12  ;;  %v472_v21 = vld [vmem:[#allocation8 + $0x8] sm:$0xff]  }
  0x2f   :  { %v81_v16 = vsub.f32 %v73_v13, %v362_v12  ;;  %v471_v20 = vld [vmem:[#allocation8 + $0x10] sm:$0xff]   ;;  %v473_v22 = vld [vmem:[#allocation8] sm:$0xff]   ;;  %p541_p4 = por %p540_p3, %p539_p2 }
  0x30   :  { %410 = vmatpush3.bf16.msra.mxu0 %v459_v2  ;;  %430 = vmatpush3.bf16.msra.mxu1 %v467_v6  ;;  %v363_v23 = vld [vmem:[%s666_s2] ss:$0 sm:$0xff] }
  0x31   :  { %411 = vmatprep.subr.bf16.mxu0 %v589_v0  ;;  %431 = vmatprep.subr.bf16.mxu1 %v589_v0  ;;  %v83_v19 = vpack.c.bf16 %v82_v17, %v81_v16  ;;  %p542_p5 = pnand %p541_p4, %p535_p1 }
  0x34   :  { %412 = vmatpush3.bf16.msra.mxu0 %v460_v3  ;;  %432 = vmatpush3.bf16.msra.mxu1 %v468_v8 }
  0x35   :  { %413 = vmatprep.subr.bf16.mxu0 %v589_v0  ;;  %433 = vmatprep.subr.bf16.mxu1 %v589_v0 }
  0x38   :  { %414 = vmatpush3.bf16.msra.mxu0 %v461_v5  ;;  %434 = vmatpush3.bf16.msra.mxu1 %v469_v10 }
  0x39   :  { %415 = vmatprep.subr.bf16.mxu0 %v589_v0  ;;  %435 = vmatprep.subr.bf16.mxu1 %v589_v0 }
  0x3c   :  { %416 = vmatpush3.bf16.msra.mxu0 %v462_v7  ;;  %436 = vmatpush3.bf16.msra.mxu1 %v470_v15 }
  0x3d   :  { %417 = vmatprep.subr.bf16.mxu0 %v589_v0  ;;  %437 = vmatprep.subr.bf16.mxu1 %v589_v0 }
  0x40   :  { %418 = vmatpush3.bf16.msra.mxu0 %v463_v9  ;;  %438 = vmatpush3.bf16.msra.mxu1 %v471_v20 }
  0x41   :  { %419 = vmatprep.subr.bf16.mxu0 %v589_v0  ;;  %439 = vmatprep.subr.bf16.mxu1 %v589_v0 }
  0x44   :  { %420 = vmatpush3.bf16.msra.mxu0 %v464_v11  ;;  %440 = vmatpush3.bf16.msra.mxu1 %v472_v21 }
  0x45   :  { %421 = vmatprep.subr.bf16.mxu0 %v589_v0  ;;  %441 = vmatprep.subr.bf16.mxu1 %v589_v0 }
  0x48   :  { %422 = vmatpush3.bf16.msra.mxu0 %v465_v18  ;;  %442 = vmatpush3.bf16.msra.mxu1 %v473_v22 }
  0x4b   :  { %424 = vmatmul.mubr.bf16.vlgmr.msra.gmra.mxu0 %v83_v19 }
 0x10b   :  { %v189_v24 = vpop.f32.mrf.mxu0 }
 0x10c   :  { %v190_v26 = vadd.f32 %v363_v23, %v189_v24 }
 0x10d   :  { %v425_v25 = vpop.f32.mrf.mxu0 }
 0x10e   :  { %v196_v30 = vmax.f32 %v190_v26, 0.0 }
 0x10f   :  { %v192_v27 = vpop.f32.mrf.mxu0 }
 0x110   :  { %v193_v28 = vadd.f32 %v363_v23, %v192_v27 }
 0x111   :  { %v426_v29 = vpop.f32.mrf.mxu0 }
 0x112   :  { %v197_v31 = vmax.f32 %v193_v28, 0.0 }
 0x114   :  { %v198_v32 = vpack.c.bf16 %v197_v31, %v196_v30 }
 0x116   :  { %388 = vst [vmem:[#allocation9] sm:$0xff] %v198_v32   ;;  %444 = vmatmul.mubr.bf16.vlgmr.msra.gmra.mxu1 %v198_v32 }
 0x117   :  { %545 = shalt.err (!%p542_p5)
}
 0x118   :  { %339 = dma.vmem_to_hbm [thread:$0]  %s334_s17, 128, %s669_s5, [#allocation5], %s583_s24, %s583_s24, %s584_s25  }
 0x119   :  { %s592_s20 = smov [#allocation10]  }
 0x11a   :  { %s345_s21 = sshll.u32 %s592_s20, 4  ;;  %s346_s21 = int_to_ptr.vmem [resolvable:$true] %s345_s21 }
 0x11b   :  { %s554_s22 = scalar_lea.vmem %s346_s21, 256  ;;  %p559_p7 = scmp.lt.s32.totalorder %s346_s21, %s346_s21 }
 0x11c   :  { %p555_p6 = scmp.ne.s32.totalorder %s346_s21, %s554_s22  ;;  %p560_p8 = scmp.lt.s32.totalorder %s554_s22, %s554_s22 }
 0x11e   :  { %p561_p9 = por %p560_p8, %p559_p7 }
 0x120   :  { %p562_p10 = pnand %p561_p9, %p555_p6 }
 0x1d6   :  { %v308_v33 = vpop.f32.mrf.mxu1 }
 0x1d7   :  { %v324_v34 = vadd.f32 %v362_v12, %v308_v33 }
 0x1d8   :  { %v445_v35 = vpop.f32.mrf.mxu1 }
 0x1d9   :  { %326 = vst [vmem:[#allocation10] sm:$0xff] %v324_v34 }
 0x1da   :  { %v311_v36 = vpop.f32.mrf.mxu1 }
 0x1db   :  { %v325_v37 = vadd.f32 %v362_v12, %v311_v36 }
 0x1dc   :  { %v446_v38 = vpop.f32.mrf.mxu1 }
 0x1dd   :  { %327 = vst [vmem:[#allocation10 + $0x8] sm:$0xff] %v325_v37 }
 0x1de   :  { %565 = shalt.err (!%p562_p10)
}
 0x1df   :  { %351 = dma.vmem_to_hbm [thread:$0]  %s346_s21, 256, %s670_s6, [#allocation11], %s586_s7, %s586_s7, %s587_s8  }
 0x1e0   :  { %578 = dma.done.wait [#allocation5], 128  }
 0x1e1   :  { %579 = vsyncadd [#allocation5], 4294967168 }
 0x1e2   :  { %580 = dma.done.wait [#allocation11], 256  }
 0x1e3   :  { %581 = vsyncadd [#allocation11], 4294967040 }
 0x1e4   :  { %358 = vsyncpa [#allocation4], 1 }
 0x1e5   :  { %359 = vsyncpa [#allocation7], 1 }
 0x1e6   :  { %360 = vsyncpa [#allocation5], 1 }
 0x1e7   :  { %361 = vsyncpa [#allocation11], 1 }

</bundles_post_ra>
